<compile_context>
chip_gen: v7x
topology: tpu7x:2x2x1
jax: 0.10.0
libtpu: 0.0.40
codegen_flags: <defaults>
</compile_context>

<pallas_src>
import functools
import math

import jax
import jax.numpy as jnp
from jax.experimental import pallas as pl
from jax.experimental.pallas import tpu as pltpu


# --------------------------- tile-size selection --------------------------- #
def _pick_tile(dim, target, base):
    """Largest tile <= target that is a multiple of `base` and divides `dim`.

    Returns the full dim when it already fits under `target` (small shapes) or
    when no aligned divisor exists.
    """
    if dim <= target:
        return dim
    t = (target // base) * base
    while t >= base:
        if dim % t == 0:
            return t
        t -= base
    return dim


_VMEM_LIMIT = 32 * 1024 * 1024  # safe on v5e/v6e/v7x, leaves double-buffer headroom


# ------------------------ fused QKV projection kernel ---------------------- #
def _qkv_matmul_kernel(x_ref, wq_ref, wk_ref, wv_ref,
                       q_ref, k_ref, v_ref,
                       q_acc, k_acc, v_acc):
    @pl.when(pl.program_id(2) == 0)
    def _init():
        q_acc[...] = jnp.zeros_like(q_acc)
        k_acc[...] = jnp.zeros_like(k_acc)
        v_acc[...] = jnp.zeros_like(v_acc)

    x = x_ref[...]  # read the activation tile once, reuse for all three dots
    q_acc[...] += jnp.dot(x, wq_ref[...], preferred_element_type=jnp.float32)
    k_acc[...] += jnp.dot(x, wk_ref[...], preferred_element_type=jnp.float32)
    v_acc[...] += jnp.dot(x, wv_ref[...], preferred_element_type=jnp.float32)

    @pl.when(pl.program_id(2) == pl.num_programs(2) - 1)
    def _finalize():
        q_ref[...] = q_acc[...].astype(q_ref.dtype)
        k_ref[...] = k_acc[...].astype(k_ref.dtype)
        v_ref[...] = v_acc[...].astype(v_ref.dtype)


def pallas_qkv_projection(x2d, wq_t, wk_t, wv_t, *,
                          tm_target=256, tn_target=256, tk_target=512):
    """x2d: (M, K); w*_t: (K, N) (already transposed). Returns (q, k, v), each (M, N)."""
    M, K = x2d.shape
    N = wq_t.shape[1]
    tm = _pick_tile(M, tm_target, 8)
    tn = _pick_tile(N, tn_target, 128)
    tk = _pick_tile(K, tk_target, 128)

    x_spec = pl.BlockSpec((tm, tk), lambda i, j, k: (i, k))
    w_spec = pl.BlockSpec((tk, tn), lambda i, j, k: (k, j))
    o_spec = pl.BlockSpec((tm, tn), lambda i, j, k: (i, j))
    out_sds = jax.ShapeDtypeStruct((M, N), x2d.dtype)

    return pl.pallas_call(
        _qkv_matmul_kernel,
        out_shape=(out_sds, out_sds, out_sds),
        grid=(M // tm, N // tn, K // tk),
        in_specs=[x_spec, w_spec, w_spec, w_spec],
        out_specs=(o_spec, o_spec, o_spec),
        scratch_shapes=[
            pltpu.VMEM((tm, tn), jnp.float32),
            pltpu.VMEM((tm, tn), jnp.float32),
            pltpu.VMEM((tm, tn), jnp.float32),
        ],
        compiler_params=pltpu.CompilerParams(
            dimension_semantics=("parallel", "parallel", "arbitrary"),
            vmem_limit_bytes=_VMEM_LIMIT,
        ),
    )(x2d, wq_t, wk_t, wv_t)


# ----------------------------- tiled linear kernel -------------------------- #
def _matmul_kernel(x_ref, w_ref, o_ref, acc_ref):
    @pl.when(pl.program_id(2) == 0)
    def _init():
        acc_ref[...] = jnp.zeros_like(acc_ref)

    acc_ref[...] += jnp.dot(x_ref[...], w_ref[...],
                            preferred_element_type=jnp.float32)

    @pl.when(pl.program_id(2) == pl.num_programs(2) - 1)
    def _finalize():
        o_ref[...] = acc_ref[...].astype(o_ref.dtype)


def pallas_linear(x2d, w_t, *, tm_target=256, tn_target=256, tk_target=512):
    """x2d: (M, K); w_t: (K, N) (already transposed). Returns (M, N)."""
    M, K = x2d.shape
    N = w_t.shape[1]
    tm = _pick_tile(M, tm_target, 8)
    tn = _pick_tile(N, tn_target, 128)
    tk = _pick_tile(K, tk_target, 128)

    return pl.pallas_call(
        _matmul_kernel,
        out_shape=jax.ShapeDtypeStruct((M, N), x2d.dtype),
        grid=(M // tm, N // tn, K // tk),
        in_specs=[pl.BlockSpec((tm, tk), lambda i, j, k: (i, k)),
                  pl.BlockSpec((tk, tn), lambda i, j, k: (k, j))],
        out_specs=pl.BlockSpec((tm, tn), lambda i, j, k: (i, j)),
        scratch_shapes=[pltpu.VMEM((tm, tn), jnp.float32)],
        compiler_params=pltpu.CompilerParams(
            dimension_semantics=("parallel", "parallel", "arbitrary"),
            vmem_limit_bytes=_VMEM_LIMIT,
        ),
    )(x2d, w_t)


# ----------------------------- attention kernel ----------------------------- #
def _attention_kernel(q_ref, k_ref, v_ref, o_ref, acc_ref, den_ref, *,
                      num_heads, head_dim, scale):
    """One grid step = (batch b, q-block qi, kv-block ki).

    q_ref/o_ref : (tq, D)   lane-dense slabs (D = num_heads * head_dim)
    k_ref/v_ref : (tk, D)
    acc_ref     : (tq, D)   f32 running numerator (persists across ki)
    den_ref     : (H, tq, 1) f32 running softmax denominator per head
    """
    kv = pl.program_id(2)

    @pl.when(kv == 0)
    def _init():
        acc_ref[...] = jnp.zeros_like(acc_ref)
        den_ref[...] = jnp.zeros_like(den_ref)

    # Fold the softmax scale into q (tq*D mults instead of H*tq*tk).
    q = q_ref[...].astype(jnp.float32) * scale
    k = k_ref[...].astype(jnp.float32)
    v = v_ref[...].astype(jnp.float32)

    for h in range(num_heads):        # static unroll over heads (columns of D)
        lo = h * head_dim
        hi = lo + head_dim
        q_h = q[:, lo:hi]             # (tq, Dh)
        k_h = k[:, lo:hi]             # (tk, Dh)
        v_h = v[:, lo:hi]             # (tk, Dh)

        # scores = q_h @ k_h^T without materializing a transpose: contract last dims.
        s = jax.lax.dot_general(q_h, k_h, (((1,), (1,)), ((), ())),
                                preferred_element_type=jnp.float32)  # (tq, tk)

        # Naive (non max-stabilized) softmax numerator — matches the Triton reference.
        p = jnp.exp(s)
        den_ref[h] += jnp.sum(p, axis=-1, keepdims=True)             # (tq, 1)
        # NOTE: for bf16 activations, cast p to bf16 here before the PV matmul.
        acc_ref[:, lo:hi] += jnp.dot(p, v_h, preferred_element_type=jnp.float32)

    @pl.when(kv == pl.num_programs(2) - 1)
    def _finalize():
        for h in range(num_heads):
            lo = h * head_dim
            hi = lo + head_dim
            inv = 1.0 / den_ref[h]                                   # (tq, 1)
            o_ref[:, lo:hi] = (acc_ref[:, lo:hi] * inv).astype(o_ref.dtype)


def pallas_attention(q, k, v, num_heads, scale, *, tq_target=256, tk_target=256):
    """q, k, v: (B, S, D) with heads packed along D. Returns (B, S, D)."""
    B, S, D = q.shape
    head_dim = D // num_heads
    tq = _pick_tile(S, tq_target, 8)
    tk = _pick_tile(S, tk_target, 8)

    kernel = functools.partial(_attention_kernel, num_heads=num_heads,
                               head_dim=head_dim, scale=scale)

    q_spec = pl.BlockSpec((None, tq, D), lambda b, qi, ki: (b, qi, 0))
    kv_spec = pl.BlockSpec((None, tk, D), lambda b, qi, ki: (b, ki, 0))
    o_spec = pl.BlockSpec((None, tq, D), lambda b, qi, ki: (b, qi, 0))

    return pl.pallas_call(
        kernel,
        out_shape=jax.ShapeDtypeStruct((B, S, D), q.dtype),
        grid=(B, S // tq, S // tk),
        in_specs=[q_spec, kv_spec, kv_spec],
        out_specs=o_spec,
        scratch_shapes=[
            pltpu.VMEM((tq, D), jnp.float32),            # numerator accumulator
            pltpu.VMEM((num_heads, tq, 1), jnp.float32),  # softmax denominators
        ],
        compiler_params=pltpu.CompilerParams(
            dimension_semantics=("parallel", "parallel", "arbitrary"),
            vmem_limit_bytes=_VMEM_LIMIT,
        ),
    )(q, k, v)


# ------------------------------- full module -------------------------------- #
def prepare_params(params):
    """Transpose PyTorch nn.Linear weights (out, in) -> (in, out) once, outside kernels."""
    return {name: jnp.asarray(w).T for name, w in params.items()}


def triton_attention_naive_forward(x, prepared, num_heads):
    """Equivalent of TritonAttentionNaive.forward.

    x: (B, S, D); prepared: dict of already-transposed weights, each (D, D).
    """
    B, S, D = x.shape
    head_dim = D // num_heads
    scale = 1.0 / math.sqrt(head_dim)

    x2d = x.reshape(B * S, D)
    # Fused QKV projection: x is read once, three lane-dense (B*S, D) outputs.
    q2d, k2d, v2d = pallas_qkv_projection(
        x2d, prepared["W_q"], prepared["W_k"], prepared["W_v"])

    # Keep the (B, S, D) layout: heads are handled inside the attention kernel,
    # so no HBM-level split_heads / merge_heads transposes are needed.
    q = q2d.reshape(B, S, D)
    k = k2d.reshape(B, S, D)
    v = v2d.reshape(B, S, D)

    o = pallas_attention(q, k, v, num_heads, scale)       # (B, S, D)
    o2d = pallas_linear(o.reshape(B * S, D), prepared["W_o"])
    return o2d.reshape(B, S, D)


# ---------------------------------- main ------------------------------------ #
if __name__ == "__main__":
    B, S, D, H = 2, 8, 32, 4   # batch, seq, d_model, num_heads (head_dim = 8)

    key = jax.random.PRNGKey(0)
    kx, kq, kk, kv, ko = jax.random.split(key, 5)

    # PyTorch nn.Linear-style weights (out_features, in_features), bias=False.
    bound = 1.0 / math.sqrt(D)
    params = {
        "W_q": jax.random.uniform(kq, (D, D), jnp.float32, -bound, bound),
        "W_k": jax.random.uniform(kk, (D, D), jnp.float32, -bound, bound),
        "W_v": jax.random.uniform(kv, (D, D), jnp.float32, -bound, bound),
        "W_o": jax.random.uniform(ko, (D, D), jnp.float32, -bound, bound),
    }
    x = jax.random.normal(kx, (B, S, D), jnp.float32)

    prepared = prepare_params(params)                     # transpose once, outside kernels
    out = triton_attention_naive_forward(x, prepared, num_heads=H)
    jax.block_until_ready(out)

    # Pure-JAX reference (same naive softmax math as the Triton kernel).
    def ref_forward(x, p):
        q = x @ p["W_q"].T
        k = x @ p["W_k"].T
        v = x @ p["W_v"].T

        def sh(t):
            return t.reshape(B, S, H, D // H).transpose(0, 2, 1, 3)

        q, k, v = sh(q), sh(k), sh(v)
        scores = jnp.einsum("bhqd,bhkd->bhqk", q, k) / math.sqrt(D // H)
        w = jnp.exp(scores)
        w = w / jnp.sum(w, axis=-1, keepdims=True)
        o = jnp.einsum("bhqk,bhkd->bhqd", w, v)
        o = o.transpose(0, 2, 1, 3).reshape(B, S, D)
        return o @ p["W_o"].T

    ref = ref_forward(x, params)
    max_err = jnp.max(jnp.abs(out - ref))
    assert jnp.allclose(out, ref, atol=2e-4, rtol=2e-4), f"max abs err {max_err}"
    print("KERNEL_OK")
</pallas_src>

<mosaic_0001>
module attributes {stable_mosaic.version = 11 : i64} {
  func.func @_qkv_matmul_kernel(%arg0: i32, %arg1: i32, %arg2: i32, %arg3: memref<16x32xf32, #tpu.memory_space<vmem>>, %arg4: memref<32x32xf32, #tpu.memory_space<vmem>>, %arg5: memref<32x32xf32, #tpu.memory_space<vmem>>, %arg6: memref<32x32xf32, #tpu.memory_space<vmem>>, %arg7: memref<16x32xf32, #tpu.memory_space<vmem>>, %arg8: memref<16x32xf32, #tpu.memory_space<vmem>>, %arg9: memref<16x32xf32, #tpu.memory_space<vmem>>, %arg10: memref<16x32xf32, #tpu.memory_space<vmem>>, %arg11: memref<16x32xf32, #tpu.memory_space<vmem>>, %arg12: memref<16x32xf32, #tpu.memory_space<vmem>>) attributes {dimension_semantics = [#tpu.dimension_semantics<parallel>, #tpu.dimension_semantics<parallel>, #tpu.dimension_semantics<arbitrary>], iteration_bounds = array<i64: 1, 1, 1>, scalar_prefetch = 0 : i64, scratch_operands = 3 : i64, tpu.core_type = #tpu.core_type<tc>, window_params = [{transform_indices = @transform_0, window_bounds = array<i64: 16, 32>}, {transform_indices = @transform_1, window_bounds = array<i64: 32, 32>}, {transform_indices = @transform_2, window_bounds = array<i64: 32, 32>}, {transform_indices = @transform_3, window_bounds = array<i64: 32, 32>}, {transform_indices = @transform_4, window_bounds = array<i64: 16, 32>}, {transform_indices = @transform_5, window_bounds = array<i64: 16, 32>}, {transform_indices = @transform_6, window_bounds = array<i64: 16, 32>}]} {
    %c0_i32 = arith.constant 0 : i32
    %0 = arith.cmpi eq, %arg2, %c0_i32 : i32
    %1 = arith.extui %0 : i1 to i32
    %c0_i32_0 = arith.constant 0 : i32
    %2 = arith.cmpi ne, %1, %c0_i32_0 : i32
    scf.if %2 {
      %cst_24 = arith.constant 0.000000e+00 : f32
      %22 = vector.broadcast %cst_24 : f32 to vector<16x32xf32>
      %c0_25 = arith.constant 0 : index
      %c0_26 = arith.constant 0 : index
      %23 = vector.load %arg10[%c0_25, %c0_26] : memref<16x32xf32, #tpu.memory_space<vmem>>, vector<16x32xf32>
      tpu.vector_store %arg10[%c0_25, %c0_26], %22 {strides = array<i32>} : memref<16x32xf32, #tpu.memory_space<vmem>>, vector<16x32xf32>,
      %cst_27 = arith.constant 0.000000e+00 : f32
      %24 = vector.broadcast %cst_27 : f32 to vector<16x32xf32>
      %c0_28 = arith.constant 0 : index
      %c0_29 = arith.constant 0 : index
      %25 = vector.load %arg11[%c0_28, %c0_29] : memref<16x32xf32, #tpu.memory_space<vmem>>, vector<16x32xf32>
      tpu.vector_store %arg11[%c0_28, %c0_29], %24 {strides = array<i32>} : memref<16x32xf32, #tpu.memory_space<vmem>>, vector<16x32xf32>,
      %cst_30 = arith.constant 0.000000e+00 : f32
      %26 = vector.broadcast %cst_30 : f32 to vector<16x32xf32>
      %c0_31 = arith.constant 0 : index
      %c0_32 = arith.constant 0 : index
      %27 = vector.load %arg12[%c0_31, %c0_32] : memref<16x32xf32, #tpu.memory_space<vmem>>, vector<16x32xf32>
      tpu.vector_store %arg12[%c0_31, %c0_32], %26 {strides = array<i32>} : memref<16x32xf32, #tpu.memory_space<vmem>>, vector<16x32xf32>,
    } else {
    }
    %c0 = arith.constant 0 : index
    %c0_1 = arith.constant 0 : index
    %3 = vector.load %arg3[%c0, %c0_1] : memref<16x32xf32, #tpu.memory_space<vmem>>, vector<16x32xf32>
    %c0_2 = arith.constant 0 : index
    %c0_3 = arith.constant 0 : index
    %4 = vector.load %arg10[%c0_2, %c0_3] : memref<16x32xf32, #tpu.memory_space<vmem>>, vector<16x32xf32>
    %c0_4 = arith.constant 0 : index
    %c0_5 = arith.constant 0 : index
    %5 = vector.load %arg4[%c0_4, %c0_5] : memref<32x32xf32, #tpu.memory_space<vmem>>, vector<32x32xf32>
    %cst = arith.constant dense<0.000000e+00> : vector<16x32xf32>
    %6 = tpu.matmul %3, %5, %cst {dimension_numbers = #tpu.dot_dimension_numbers<[1], [0], [0], [1], [0, 0, 1, 1], [], []>} : vector<16x32xf32>, vector<32x32xf32>, vector<16x32xf32> -> vector<16x32xf32>
    %7 = arith.addf %4, %6 : vector<16x32xf32>
    %c0_6 = arith.constant 0 : index
    %c0_7 = arith.constant 0 : index
    %8 = vector.load %arg10[%c0_6, %c0_7] : memref<16x32xf32, #tpu.memory_space<vmem>>, vector<16x32xf32>
    tpu.vector_store %arg10[%c0_6, %c0_7], %7 {strides = array<i32>} : memref<16x32xf32, #tpu.memory_space<vmem>>, vector<16x32xf32>,
    %c0_8 = arith.constant 0 : index
    %c0_9 = arith.constant 0 : index
    %9 = vector.load %arg11[%c0_8, %c0_9] : memref<16x32xf32, #tpu.memory_space<vmem>>, vector<16x32xf32>
    %c0_10 = arith.constant 0 : index
    %c0_11 = arith.constant 0 : index
    %10 = vector.load %arg5[%c0_10, %c0_11] : memref<32x32xf32, #tpu.memory_space<vmem>>, vector<32x32xf32>
    %cst_12 = arith.constant dense<0.000000e+00> : vector<16x32xf32>
    %11 = tpu.matmul %3, %10, %cst_12 {dimension_numbers = #tpu.dot_dimension_numbers<[1], [0], [0], [1], [0, 0, 1, 1], [], []>} : vector<16x32xf32>, vector<32x32xf32>, vector<16x32xf32> -> vector<16x32xf32>
    %12 = arith.addf %9, %11 : vector<16x32xf32>
    %c0_13 = arith.constant 0 : index
    %c0_14 = arith.constant 0 : index
    %13 = vector.load %arg11[%c0_13, %c0_14] : memref<16x32xf32, #tpu.memory_space<vmem>>, vector<16x32xf32>
    tpu.vector_store %arg11[%c0_13, %c0_14], %12 {strides = array<i32>} : memref<16x32xf32, #tpu.memory_space<vmem>>, vector<16x32xf32>,
    %c0_15 = arith.constant 0 : index
    %c0_16 = arith.constant 0 : index
    %14 = vector.load %arg12[%c0_15, %c0_16] : memref<16x32xf32, #tpu.memory_space<vmem>>, vector<16x32xf32>
    %c0_17 = arith.constant 0 : index
    %c0_18 = arith.constant 0 : index
    %15 = vector.load %arg6[%c0_17, %c0_18] : memref<32x32xf32, #tpu.memory_space<vmem>>, vector<32x32xf32>
    %cst_19 = arith.constant dense<0.000000e+00> : vector<16x32xf32>
    %16 = tpu.matmul %3, %15, %cst_19 {dimension_numbers = #tpu.dot_dimension_numbers<[1], [0], [0], [1], [0, 0, 1, 1], [], []>} : vector<16x32xf32>, vector<32x32xf32>, vector<16x32xf32> -> vector<16x32xf32>
    %17 = arith.addf %14, %16 : vector<16x32xf32>
    %c0_20 = arith.constant 0 : index
    %c0_21 = arith.constant 0 : index
    %18 = vector.load %arg12[%c0_20, %c0_21] : memref<16x32xf32, #tpu.memory_space<vmem>>, vector<16x32xf32>
    tpu.vector_store %arg12[%c0_20, %c0_21], %17 {strides = array<i32>} : memref<16x32xf32, #tpu.memory_space<vmem>>, vector<16x32xf32>,
    %c0_i32_22 = arith.constant 0 : i32
    %19 = arith.cmpi eq, %arg2, %c0_i32_22 : i32
    %20 = arith.extui %19 : i1 to i32
    %c0_i32_23 = arith.constant 0 : i32
    %21 = arith.cmpi ne, %20, %c0_i32_23 : i32
    scf.if %21 {
      %c0_24 = arith.constant 0 : index
      %c0_25 = arith.constant 0 : index
      %22 = vector.load %arg10[%c0_24, %c0_25] : memref<16x32xf32, #tpu.memory_space<vmem>>, vector<16x32xf32>
      %c0_26 = arith.constant 0 : index
      %c0_27 = arith.constant 0 : index
      %23 = vector.load %arg7[%c0_26, %c0_27] : memref<16x32xf32, #tpu.memory_space<vmem>>, vector<16x32xf32>
      tpu.vector_store %arg7[%c0_26, %c0_27], %22 {strides = array<i32>} : memref<16x32xf32, #tpu.memory_space<vmem>>, vector<16x32xf32>,
      %c0_28 = arith.constant 0 : index
      %c0_29 = arith.constant 0 : index
      %24 = vector.load %arg11[%c0_28, %c0_29] : memref<16x32xf32, #tpu.memory_space<vmem>>, vector<16x32xf32>
      %c0_30 = arith.constant 0 : index
      %c0_31 = arith.constant 0 : index
      %25 = vector.load %arg8[%c0_30, %c0_31] : memref<16x32xf32, #tpu.memory_space<vmem>>, vector<16x32xf32>
      tpu.vector_store %arg8[%c0_30, %c0_31], %24 {strides = array<i32>} : memref<16x32xf32, #tpu.memory_space<vmem>>, vector<16x32xf32>,
      %c0_32 = arith.constant 0 : index
      %c0_33 = arith.constant 0 : index
      %26 = vector.load %arg12[%c0_32, %c0_33] : memref<16x32xf32, #tpu.memory_space<vmem>>, vector<16x32xf32>
      %c0_34 = arith.constant 0 : index
      %c0_35 = arith.constant 0 : index
      %27 = vector.load %arg9[%c0_34, %c0_35] : memref<16x32xf32, #tpu.memory_space<vmem>>, vector<16x32xf32>
      tpu.vector_store %arg9[%c0_34, %c0_35], %26 {strides = array<i32>} : memref<16x32xf32, #tpu.memory_space<vmem>>, vector<16x32xf32>,
    } else {
    }
    return
  }
  func.func @transform_0(%arg0: i32, %arg1: i32, %arg2: i32) -> (i32, i32) {
    %c0_i32 = arith.constant 0 : i32
    return %arg0, %arg2 : i32, i32
  }
  func.func @transform_1(%arg0: i32, %arg1: i32, %arg2: i32) -> (i32, i32) {
    %c0_i32 = arith.constant 0 : i32
    return %arg2, %arg1 : i32, i32
  }
  func.func @transform_2(%arg0: i32, %arg1: i32, %arg2: i32) -> (i32, i32) {
    %c0_i32 = arith.constant 0 : i32
    return %arg2, %arg1 : i32, i32
  }
  func.func @transform_3(%arg0: i32, %arg1: i32, %arg2: i32) -> (i32, i32) {
    %c0_i32 = arith.constant 0 : i32
    return %arg2, %arg1 : i32, i32
  }
  func.func @transform_4(%arg0: i32, %arg1: i32, %arg2: i32) -> (i32, i32) {
    %c0_i32 = arith.constant 0 : i32
    return %arg0, %arg1 : i32, i32
  }
  func.func @transform_5(%arg0: i32, %arg1: i32, %arg2: i32) -> (i32, i32) {
    %c0_i32 = arith.constant 0 : i32
    return %arg0, %arg1 : i32, i32
  }
  func.func @transform_6(%arg0: i32, %arg1: i32, %arg2: i32) -> (i32, i32) {
    %c0_i32 = arith.constant 0 : i32
    return %arg0, %arg1 : i32, i32
  }
}

</mosaic_0001>

<bundles_post_ra>
// kernel: tpu_custom_call.1
= control target key start
LH: loop header
LB: loop body
LE: loop exit
PB: predicated region body
PF: predicated region fallthrough
CT: control target
= control target key end

     0   :  { %12 = vsyncpa [#allocation6], 0  ;;  %s867_s0 = inlined_call_operand.hbm [shape: f32[16,32], index: 0, kind: input, shape index: {}]   ;;  %s868_s1 = inlined_call_operand.hbm [shape: f32[32,32], index: 1, kind: input, shape index: {}]   ;;  %s869_s2 = inlined_call_operand.hbm [shape: f32[32,32], index: 2, kind: input, shape index: {}]   ;;  %s870_s3 = inlined_call_operand.hbm [shape: f32[32,32], index: 3, kind: input, shape index: {}]   ;;  %s871_s4 = inlined_call_operand.hbm [shape: f32[16,32], index: 4, kind: output, shape index: {0}]   ;;  %s872_s5 = inlined_call_operand.hbm [shape: f32[16,32], index: 5, kind: output, shape index: {1}]   ;;  %s873_s6 = inlined_call_operand.hbm [shape: f32[16,32], index: 6, kind: output, shape index: {2}]  }
   0x1   :  { %13 = vsyncpa [#allocation9], 0 }
   0x2   :  { %14 = vsyncpa [#allocation12], 0 }
   0x3   :  { %15 = vsyncpa [#allocation7], 0 }
   0x4   :  { %16 = vsyncpa [#allocation15], 0  ;;  %s672_s21 = smov [#allocation8]   ;;  %s673_s23 = smov [#allocation5]  }
   0x5   :  { %s34_s22 = sshll.u32 %s672_s21, 4  ;;  %s22_s24 = sshll.u32 %s673_s23, 4  ;;  %s35_s22 = int_to_ptr.vmem [resolvable:$true] %s34_s22  ;;  %s717_s24 = int_to_ptr.vmem [resolvable:$true] %s22_s24 }
   0x6   :  { %s508_s27 = scalar_lea.hbm %s868_s1, 512 }
   0x7   :  { %p509_p0 = scmp.ne.s32.totalorder %s868_s1, %s508_s27  ;;  %p512_p1 = scmp.lt.u32.totalorder %s508_s27, %s868_s1 }
   0x9   :  { %p514_p2 = pnand %p512_p1, %p509_p0 }
   0xb   :  { %517 = shalt.err (!%p514_p2)
}
   0xc   :  { %s518_s8 = scalar_lea.vmem %s35_s22, 512  ;;  %p523_p4 = scmp.lt.s32.totalorder %s35_s22, %s35_s22 }
   0xd   :  { %p519_p3 = scmp.ne.s32.totalorder %s35_s22, %s518_s8  ;;  %p524_p5 = scmp.lt.s32.totalorder %s518_s8, %s518_s8 }
   0xf   :  { %p525_p6 = por %p524_p5, %p523_p4 }
  0x11   :  { %p526_p7 = pnand %p525_p6, %p519_p3 }
  0x13   :  { %529 = shalt.err (!%p526_p7)
}
  0x14   :  { %s674_s9 = smov 128   ;;  %s675_s10 = smov 8  }
  0x15   :  { %40 = dma.hbm_to_vmem [thread:$0]  %s868_s1, 512, %s35_s22, [#allocation9], %s674_s9, %s674_s9, %s675_s10  }
  0x16   :  { %s530_s15 = scalar_lea.hbm %s867_s0, 256 }
  0x17   :  { %p531_p8 = scmp.ne.s32.totalorder %s867_s0, %s530_s15  ;;  %p534_p9 = scmp.lt.u32.totalorder %s530_s15, %s867_s0 }
  0x19   :  { %p536_p10 = pnand %p534_p9, %p531_p8 }
  0x1b   :  { %539 = shalt.err (!%p536_p10)
}
  0x1c   :  { %s540_s20 = scalar_lea.vmem %s717_s24, 256  ;;  %p545_p12 = scmp.lt.s32.totalorder %s717_s24, %s717_s24 }
  0x1d   :  { %p541_p11 = scmp.ne.s32.totalorder %s717_s24, %s540_s20  ;;  %p546_p13 = scmp.lt.s32.totalorder %s540_s20, %s540_s20 }
  0x1f   :  { %p547_p0 = por %p546_p13, %p545_p12 }
  0x21   :  { %p548_p1 = pnand %p547_p0, %p541_p11 }
  0x23   :  { %551 = shalt.err (!%p548_p1)
}
  0x24   :  { %28 = dma.hbm_to_vmem [thread:$0]  %s867_s0, 256, %s717_s24, [#allocation6], %s674_s9, %s674_s9, %s675_s10  }
  0x25   :  { %s676_s22 = smov [#allocation10]   ;;  %s677_s25 = smov [#allocation11]  }
  0x26   :  { %s46_s23 = sshll.u32 %s676_s22, 4  ;;  %s58_s26 = sshll.u32 %s677_s25, 4  ;;  %s47_s23 = int_to_ptr.vmem [resolvable:$true] %s46_s23  ;;  %s754_s26 = int_to_ptr.vmem [resolvable:$true] %s58_s26 }
  0x27   :  { %s552_s29 = scalar_lea.hbm %s869_s2, 512 }
  0x28   :  { %p553_p2 = scmp.ne.s32.totalorder %s869_s2, %s552_s29  ;;  %p556_p3 = scmp.lt.u32.totalorder %s552_s29, %s869_s2 }
  0x2a   :  { %p558_p4 = pnand %p556_p3, %p553_p2 }
  0x2c   :  { %561 = shalt.err (!%p558_p4)
}
  0x2d   :  { %s562_s0 = scalar_lea.vmem %s47_s23, 512  ;;  %p567_p6 = scmp.lt.s32.totalorder %s47_s23, %s47_s23 }
  0x2e   :  { %p563_p5 = scmp.ne.s32.totalorder %s47_s23, %s562_s0  ;;  %p568_p7 = scmp.lt.s32.totalorder %s562_s0, %s562_s0 }
  0x30   :  { %p569_p8 = por %p568_p7, %p567_p6 }
  0x32   :  { %p570_p9 = pnand %p569_p8, %p563_p5 }
  0x34   :  { %573 = shalt.err (!%p570_p9)
}
  0x35   :  { %52 = dma.hbm_to_vmem [thread:$0]  %s869_s2, 512, %s47_s23, [#allocation9], %s674_s9, %s674_s9, %s675_s10  }
  0x36   :  { %s574_s15 = scalar_lea.hbm %s870_s3, 512 }
  0x37   :  { %p575_p10 = scmp.ne.s32.totalorder %s870_s3, %s574_s15  ;;  %p578_p11 = scmp.lt.u32.totalorder %s574_s15, %s870_s3 }
  0x39   :  { %p580_p12 = pnand %p578_p11, %p575_p10 }
  0x3b   :  { %583 = shalt.err (!%p580_p12)
}
  0x3c   :  { %s584_s20 = scalar_lea.vmem %s754_s26, 512  ;;  %p589_p0 = scmp.lt.s32.totalorder %s754_s26, %s754_s26 }
  0x3d   :  { %p585_p13 = scmp.ne.s32.totalorder %s754_s26, %s584_s20  ;;  %p590_p1 = scmp.lt.s32.totalorder %s584_s20, %s584_s20 }
  0x3f   :  { %p591_p2 = por %p590_p1, %p589_p0 }
  0x41   :  { %p592_p3 = pnand %p591_p2, %p585_p13 }
  0x43   :  { %595 = shalt.err (!%p592_p3)
}
  0x44   :  { %64 = dma.hbm_to_vmem [thread:$0]  %s870_s3, 512, %s754_s26, [#allocation12], %s674_s9, %s674_s9, %s675_s10  }
  0x45   :  { %662 = dma.done.wait [#allocation6], 256  }
  0x46   :  { %663 = vsyncadd [#allocation6], 4294967040 }
  0x47   :  { %664 = dma.done.wait [#allocation9], 1024  }
  0x48   :  { %665 = vsyncadd [#allocation9], 4294966272 }
  0x49   :  { %666 = dma.done.wait [#allocation12], 512  }
  0x4a   :  { %667 = vsyncadd [#allocation12], 4294966784  ;;  %vm81_vm0 = vcmask 261120   ;;  %v678_v0 = vmov 0.0   ;;  %v92_v1 = vld [vmem:[#allocation8] sm:$0xff]  ;;  %v93_v2 = vld [vmem:[#allocation8 + $0x8] sm:$0xff] }
  0x4b   :  { %83 = vst.msk [vmem:[#allocation2 + $0x8] sm:$0xff] %vm81_vm0, %v678_v0  ;;  %82 = vst.msk [vmem:[#allocation2] sm:$0xff] %vm81_vm0, %v678_v0  ;;  %v94_v3 = vld [vmem:[#allocation8 + $0x10] sm:$0xff]  ;;  %v474_v4 = vpack.c.bf16 %v93_v2, %v92_v1  ;;  %v95_v5 = vld [vmem:[#allocation8 + $0x18] sm:$0xff]  ;;  %s679_s3 = smov [#allocation13]   ;;  %s680_s22 = smov [#allocation14]  }
  0x4c   :  { %84 = vst.msk [vmem:[#allocation3] sm:$0xff] %vm81_vm0, %v678_v0  ;;  %85 = vst.msk [vmem:[#allocation3 + $0x8] sm:$0xff] %vm81_vm0, %v678_v0  ;;  %v184_v6 = vld [vmem:[#allocation10] sm:$0xff]  ;;  %v185_v7 = vld [vmem:[#allocation10 + $0x8] sm:$0xff]  ;;  %v478_v8 = vpack.c.bf16 %v95_v5, %v94_v3  ;;  %s372_s21 = sshll.u32 %s679_s3, 4  ;;  %s384_s23 = sshll.u32 %s680_s22, 4  ;;  %s373_s21 = int_to_ptr.vmem [resolvable:$true] %s372_s21  ;;  %s808_s23 = int_to_ptr.vmem [resolvable:$true] %s384_s23 }
  0x4d   :  { %86 = vst.msk [vmem:[#allocation4] sm:$0xff] %vm81_vm0, %v678_v0  ;;  %87 = vst.msk [vmem:[#allocation4 + $0x8] sm:$0xff] %vm81_vm0, %v678_v0  ;;  %v482_v9 = vpack.c.bf16 %v185_v7, %v184_v6  ;;  %v88_v10 = vld [vmem:[#allocation5] sm:$0xff]  ;;  %v269_v11 = vld [vmem:[#allocation11] sm:$0xff]  ;;  %475 = vmatprep.subr.bf16.mxu0 %v474_v4  ;;  %s596_s25 = scalar_lea.vmem %s373_s21, 256  ;;  %p601_p5 = scmp.lt.s32.totalorder %s373_s21, %s373_s21 }
  0x4e   :  { %449 = vmatprep.mubr.msk.f32.mxu0 %vm81_vm0, %v88_v10  ;;  %v270_v12 = vld [vmem:[#allocation11 + $0x8] sm:$0xff]  ;;  %v186_v13 = vld [vmem:[#allocation10 + $0x10] sm:$0xff]  ;;  %v187_v14 = vld [vmem:[#allocation10 + $0x18] sm:$0xff]  ;;  %477 = vmatpush3.bf16.msra.mxu0 %v474_v4  ;;  %p597_p4 = scmp.ne.s32.totalorder %s373_s21, %s596_s25  ;;  %p602_p6 = scmp.lt.s32.totalorder %s596_s25, %s596_s25 }
  0x4f   :  { %483 = vmatprep.subr.bf16.mxu1 %v482_v9  ;;  %v486_v15 = vpack.c.bf16 %v187_v14, %v186_v13  ;;  %479 = vmatprep.subr.bf16.mxu0 %v478_v8  ;;  %v490_v16 = vpack.c.bf16 %v270_v12, %v269_v11  ;;  %v271_v17 = vld [vmem:[#allocation11 + $0x10] sm:$0xff]  ;;  %v272_v18 = vld [vmem:[#allocation11 + $0x18] sm:$0xff] }
  0x50   :  { %485 = vmatpush3.bf16.msra.mxu1 %v482_v9  ;;  %460 = vmatprep.mubr.msk.f32.mxu1 %vm81_vm0, %v88_v10  ;;  %v89_v19 = vld [vmem:[#allocation5 + $0x8] sm:$0xff]  ;;  %v494_v20 = vpack.c.bf16 %v272_v18, %v271_v17  ;;  %p603_p7 = por %p602_p6, %p601_p5 }
  0x51   :  { %487 = vmatprep.subr.bf16.mxu1 %v486_v15 }
  0x52   :  { %481 = vmatpush3.bf16.msra.mxu0 %v478_v8  ;;  %v91_v21 = vld [vmem:[#allocation2 + $0x8] sm:$0xff]  ;;  %v90_v22 = vld [vmem:[#allocation2] sm:$0xff]  ;;  %p604_p8 = pnand %p603_p7, %p597_p4 }
  0x53   :  { %491 = vmatprep.subr.bf16.mxu0 %v490_v16  ;;  %v183_v23 = vld [vmem:[#allocation3 + $0x8] sm:$0xff]  ;;  %v182_v25 = vld [vmem:[#allocation3] sm:$0xff] }
  0x54   :  { %489 = vmatpush3.bf16.msra.mxu1 %v486_v15  ;;  %v268_v33 = vld [vmem:[#allocation4 + $0x8] sm:$0xff]  ;;  %v267_v34 = vld [vmem:[#allocation4] sm:$0xff] }
  0x55   :  { %450 = vmatmul.mubr.msk.f32.vlgmr.msra.gmra.mrb[0].mxu0 %vm81_vm0, %v89_v19 }
  0x56   :  { %493 = vmatpush3.bf16.msra.mxu0 %v490_v16  ;;  %471 = vmatprep.mubr.msk.f32.mxu0 %vm81_vm0, %v88_v10 }
  0x57   :  { %461 = vmatmul.mubr.msk.f32.vlgmr.msra.gmra.mrb[0].mxu1 %vm81_vm0, %v89_v19  ;;  %495 = vmatprep.subr.bf16.mxu0 %v494_v20 }
  0x5a   :  { %497 = vmatpush3.bf16.msra.mxu0 %v494_v20 }
  0x5d   :  { %472 = vmatmul.mubr.msk.f32.vlgmr.msra.gmra.mrb[2].mxu0 %vm81_vm0, %v89_v19 }
 0x128   :  { %v451_v24 = vpop.f32.mrb[0].mxu0 }
 0x129   :  { %v179_v26 = vadd.f32 %v451_v24, %v91_v21  ;;  %v169_v27 = vpop.f32.mrb[1].mxu0 }
 0x12a   :  { %v462_v28 = vpop.f32.mrb[0].mxu1  ;;  %v178_v29 = vadd.f32 %v169_v27, %v90_v22 }
 0x12b   :  { %v264_v30 = vadd.f32 %v462_v28, %v183_v23  ;;  %v254_v31 = vpop.f32.mrb[1].mxu1  ;;  %181 = vst.msk [vmem:[#allocation2 + $0x8] sm:$0xff] %vm81_vm0, %v179_v26 }
 0x12c   :  { %v263_v32 = vadd.f32 %v254_v31, %v182_v25  ;;  %180 = vst.msk [vmem:[#allocation2] sm:$0xff] %vm81_vm0, %v178_v29 }
 0x12d   :  { %266 = vst.msk [vmem:[#allocation3 + $0x8] sm:$0xff] %vm81_vm0, %v264_v30 }
 0x12e   :  { %265 = vst.msk [vmem:[#allocation3] sm:$0xff] %vm81_vm0, %v263_v32 }
 0x130   :  { %v473_v35 = vpop.f32.mrb[2].mxu0 }
 0x131   :  { %v349_v36 = vadd.f32 %v473_v35, %v268_v33  ;;  %v339_v37 = vpop.f32.mrb[3].mxu0 }
 0x132   :  { %v348_v38 = vadd.f32 %v339_v37, %v267_v34  ;;  %v356_v39 = vld [vmem:[#allocation2 + $0x8] sm:$0xff] }
 0x133   :  { %351 = vst.msk [vmem:[#allocation4 + $0x8] sm:$0xff] %vm81_vm0, %v349_v36  ;;  %v355_v41 = vld [vmem:[#allocation2] sm:$0xff]  ;;  %358 = vst.msk [vmem:[#allocation13 + $0x8] sm:$0xff] %vm81_vm0, %v356_v39 }
 0x134   :  { %v360_v40 = vld [vmem:[#allocation3 + $0x8] sm:$0xff]  ;;  %350 = vst.msk [vmem:[#allocation4] sm:$0xff] %vm81_vm0, %v348_v38  ;;  %357 = vst.msk [vmem:[#allocation13] sm:$0xff] %vm81_vm0, %v355_v41 }
 0x135   :  { %v359_v42 = vld [vmem:[#allocation3] sm:$0xff]  ;;  %362 = vst.msk [vmem:[#allocation14 + $0x8] sm:$0xff] %vm81_vm0, %v360_v40 }
 0x136   :  { %361 = vst.msk [vmem:[#allocation14] sm:$0xff] %vm81_vm0, %v359_v42 }
 0x137   :  { %607 = shalt.err (!%p604_p8)
}
 0x138   :  { %s608_s28 = scalar_lea.hbm %s871_s4, 256 }
 0x139   :  { %p609_p9 = scmp.ne.s32.totalorder %s871_s4, %s608_s28  ;;  %p612_p10 = scmp.lt.u32.totalorder %s608_s28, %s871_s4 }
 0x13b   :  { %p614_p11 = pnand %p612_p10, %p609_p9 }
 0x13d   :  { %617 = shalt.err (!%p614_p11)
}
 0x13e   :  { %378 = dma.vmem_to_hbm [thread:$0]  %s373_s21, 256, %s871_s4, [#allocation7], %s674_s9, %s674_s9, %s675_s10  }
 0x13f   :  { %s618_s24 = scalar_lea.vmem %s808_s23, 256  ;;  %p623_p13 = scmp.lt.s32.totalorder %s808_s23, %s808_s23 }
 0x140   :  { %p619_p12 = scmp.ne.s32.totalorder %s808_s23, %s618_s24  ;;  %p624_p0 = scmp.lt.s32.totalorder %s618_s24, %s618_s24 }
 0x142   :  { %p625_p1 = por %p624_p0, %p623_p13 }
 0x144   :  { %p626_p2 = pnand %p625_p1, %p619_p12 }
 0x146   :  { %629 = shalt.err (!%p626_p2)
}
 0x147   :  { %s630_s14 = scalar_lea.hbm %s872_s5, 256 }
 0x148   :  { %p631_p3 = scmp.ne.s32.totalorder %s872_s5, %s630_s14  ;;  %p634_p4 = scmp.lt.u32.totalorder %s630_s14, %s872_s5 }
 0x14a   :  { %p636_p5 = pnand %p634_p4, %p631_p3 }
 0x14c   :  { %639 = shalt.err (!%p636_p5)
}
 0x14d   :  { %390 = dma.vmem_to_hbm [thread:$0]  %s808_s23, 256, %s872_s5, [#allocation15], %s674_s9, %s674_s9, %s675_s10   ;;  %v364_v43 = vld [vmem:[#allocation4 + $0x8] sm:$0xff]  ;;  %v363_v44 = vld [vmem:[#allocation4] sm:$0xff] }
 0x14e   :  { %s681_s20 = smov [#allocation16]   ;;  %366 = vst.msk [vmem:[#allocation16 + $0x8] sm:$0xff] %vm81_vm0, %v364_v43  ;;  %365 = vst.msk [vmem:[#allocation16] sm:$0xff] %vm81_vm0, %v363_v44 }
 0x14f   :  { %s396_s2 = sshll.u32 %s681_s20, 4  ;;  %s397_s2 = int_to_ptr.vmem [resolvable:$true] %s396_s2 }
 0x150   :  { %s640_s1 = scalar_lea.vmem %s397_s2, 256  ;;  %p645_p7 = scmp.lt.s32.totalorder %s397_s2, %s397_s2 }
 0x151   :  { %p641_p6 = scmp.ne.s32.totalorder %s397_s2, %s640_s1  ;;  %p646_p8 = scmp.lt.s32.totalorder %s640_s1, %s640_s1 }
 0x153   :  { %p647_p9 = por %p646_p8, %p645_p7 }
 0x155   :  { %p648_p10 = pnand %p647_p9, %p641_p6 }
 0x157   :  { %651 = shalt.err (!%p648_p10)
}
 0x158   :  { %s652_s5 = scalar_lea.hbm %s873_s6, 256 }
 0x159   :  { %p653_p11 = scmp.ne.s32.totalorder %s873_s6, %s652_s5  ;;  %p656_p12 = scmp.lt.u32.totalorder %s652_s5, %s873_s6 }
 0x15b   :  { %p658_p13 = pnand %p656_p12, %p653_p11 }
 0x15d   :  { %661 = shalt.err (!%p658_p13)
}
 0x15e   :  { %402 = dma.vmem_to_hbm [thread:$0]  %s397_s2, 256, %s873_s6, [#allocation15], %s674_s9, %s674_s9, %s675_s10  }
 0x15f   :  { %668 = dma.done.wait [#allocation7], 256  }
 0x160   :  { %669 = vsyncadd [#allocation7], 4294967040 }
 0x161   :  { %670 = dma.done.wait [#allocation15], 512  }
 0x162   :  { %671 = vsyncadd [#allocation15], 4294966784 }
 0x163   :  { %412 = vsyncpa [#allocation6], 1 }
 0x164   :  { %413 = vsyncpa [#allocation9], 1 }
 0x165   :  { %414 = vsyncpa [#allocation12], 1 }
 0x166   :  { %415 = vsyncpa [#allocation7], 1 }
 0x167   :  { %416 = vsyncpa [#allocation15], 1 }

</bundles_post_ra>
